<compile_context>
chip_gen: v5e
topology: v5e:2x2
jax: 0.10.0
libtpu: 0.0.40
codegen_flags: <defaults>
</compile_context>

<pallas_src>
import functools
import math

import jax
import jax.numpy as jnp
import numpy as np
from jax.experimental import pallas as pl
from jax.experimental.pallas import tpu as pltpu


def _round_up(x, m):
    return (x + m - 1) // m * m


# ----------------------------- Pallas kernel -----------------------------

def _mlp_fused_kernel(num_layers, sigmoid_output, *refs):
    # refs = (x_ref, w0, b0, w1, b1, ..., w_{L-1}, b_{L-1}, out_ref)
    # x / w_i are bf16, b_i are f32, out is f32.  Matmuls accumulate in f32 on
    # the MXU; activations are re-cast to bf16 between layers.
    x_ref, out_ref = refs[0], refs[-1]
    wb = refs[1:-1]

    h = x_ref[...]                                   # (tile_r, in_pad) bf16
    for i in range(num_layers):                      # static unrolled layer loop
        w = wb[2 * i][...]                           # (d_in_pad, d_out_pad) bf16
        b = wb[2 * i + 1][...]                       # (1, d_out_pad) f32
        acc = jnp.dot(h, w, preferred_element_type=jnp.float32) + b
        if i < num_layers - 1:
            h = jnp.maximum(acc, 0.0).astype(jnp.bfloat16)   # ReLU between layers only
        else:
            h = acc                                  # final layer stays f32
    if sigmoid_output:
        h = jax.nn.sigmoid(h)                        # exp on EUP
    out_ref[...] = h.astype(out_ref.dtype)


# ----------------------- one-time parameter preparation -----------------------

def prepare_mlp_params(params):
    """Pad/cast parameters once (hoisted out of the per-call forward path).

    params: list of {"w": (in_dim, out_dim), "b": (out_dim,)} per layer
            (weights stored pre-transposed relative to torch.nn.Linear).
    Returns (wb, dims, pdims, out_dim) where wb = (w0, b0, w1, b1, ...) with
    bf16 weights padded to 128-multiples and f32 biases of shape (1, out_pad).
    Zero padding keeps the math exact; padded output columns are sliced off.
    """
    dims = [params[0]["w"].shape[0]] + [p["w"].shape[1] for p in params]
    pdims = [_round_up(d, 128) for d in dims]
    wb = []
    for i, p in enumerate(params):
        w = jnp.pad(p["w"].astype(jnp.bfloat16),
                    ((0, pdims[i] - dims[i]), (0, pdims[i + 1] - dims[i + 1])))
        b = jnp.pad(p["b"].astype(jnp.float32).reshape(1, -1),
                    ((0, 0), (0, pdims[i + 1] - dims[i + 1])))
        wb += [w, b]
    return tuple(wb), tuple(dims), tuple(pdims), dims[-1]


# --------------- probe: single-buffered grid-resident blocks ---------------

_SINGLE_BUFFER_OK = None


def _single_buffer_supported():
    """Check once whether pipeline_mode=pl.Buffered(buffer_count=1) is accepted
    (halves VMEM for grid-resident weight blocks); fall back to the default
    double-buffering otherwise so the kernel always runs."""
    global _SINGLE_BUFFER_OK
    if _SINGLE_BUFFER_OK is not None:
        return _SINGLE_BUFFER_OK
    try:
        def copy_kernel(x_ref, o_ref):
            o_ref[...] = x_ref[...]

        spec = pl.BlockSpec((8, 128), lambda i: (0, 0),
                            pipeline_mode=pl.Buffered(buffer_count=1))
        x = jnp.arange(8 * 128, dtype=jnp.float32).reshape(8, 128)
        y = pl.pallas_call(
            copy_kernel,
            out_shape=jax.ShapeDtypeStruct((8, 128), jnp.float32),
            grid=(1,),
            in_specs=[spec],
            out_specs=pl.BlockSpec((8, 128), lambda i: (0, 0)),
        )(x)
        _SINGLE_BUFFER_OK = bool(np.allclose(np.asarray(y), np.asarray(x)))
    except Exception:
        _SINGLE_BUFFER_OK = False
    return _SINGLE_BUFFER_OK


# ----------------------------- forward wrapper -----------------------------

def _mlp_forward_impl(x, wb, *, num_layers, dims, pdims, out_dim,
                      sigmoid_output, row_tile, single_buffer):
    orig_shape = x.shape
    in_dim = dims[0]
    rows = int(np.prod(orig_shape[:-1])) if len(orig_shape) > 1 else 1

    # ---- row tiling: no row padding, grid = cdiv(rows, tile_r) ----
    rows8 = _round_up(rows, 8)
    tile_r = min(row_tile, rows8)
    if rows >= 16:
        # >= 2 grid steps so the "parallel" axis splits across both v7x TensorCores.
        tile_r = min(tile_r, _round_up(pl.cdiv(rows, 2), 8))
    tile_r = max(8, min(rows8, _round_up(tile_r, 16)))   # bf16 sublane packing

    # ---- VMEM budget: cap tile_r, then set an explicit scoped limit ----
    buf = 1 if single_buffer else 2
    wb_bytes = sum(int(a.size) * a.dtype.itemsize for a in wb)

    def working_set(t):
        act = 2 * t * max(pdims) * 4                        # widest f32 acc + bf16 copy
        io = 2 * t * pdims[0] * 2 + 2 * t * pdims[-1] * 4   # double-buffered in/out tiles
        return buf * wb_bytes + act + io

    vmem_budget = 48 << 20   # conservative working budget (fits v7x's 64 MiB physical)
    while tile_r > 16 and working_set(tile_r) > vmem_budget:
        tile_r = _round_up(tile_r // 2, 16)
    vmem_limit = int(min(64 << 20, max(16 << 20, 2 * working_set(tile_r) + (2 << 20))))
    # TODO(synk): add a K/N-tiled fallback (VMEM f32 accumulator, "arbitrary"
    # reduction axis) for hidden dims whose resident weights exceed the VMEM
    # budget; this fully-resident path assumes all layer weights fit.

    # Per-call activation handling only: cast to bf16, pad the feature dim to 128.
    x2 = x.reshape(rows, in_dim).astype(jnp.bfloat16)
    if pdims[0] != in_dim:
        x2 = jnp.pad(x2, ((0, 0), (0, pdims[0] - in_dim)))

    in_specs = [pl.BlockSpec((tile_r, pdims[0]), lambda i: (i, 0))]
    for a in wb:  # full-array blocks, constant index_map -> VMEM-resident across grid
        if single_buffer:
            in_specs.append(pl.BlockSpec(a.shape, lambda i: (0, 0),
                                         pipeline_mode=pl.Buffered(buffer_count=1)))
        else:
            in_specs.append(pl.BlockSpec(a.shape, lambda i: (0, 0)))

    out = pl.pallas_call(
        functools.partial(_mlp_fused_kernel, num_layers, sigmoid_output),
        out_shape=jax.ShapeDtypeStruct((rows, pdims[-1]), jnp.float32),
        grid=(pl.cdiv(rows, tile_r),),
        in_specs=in_specs,
        out_specs=pl.BlockSpec((tile_r, pdims[-1]), lambda i: (i, 0)),
        compiler_params=pltpu.CompilerParams(
            dimension_semantics=("parallel",),   # independent row tiles -> megacore
            vmem_limit_bytes=vmem_limit),
    )(x2, *wb)

    if pdims[-1] != out_dim:
        out = out[:, :out_dim]
    return out.reshape(*orig_shape[:-1], out_dim)


def make_mlp(params, sigmoid_output=False, row_tile=256):
    """Prepare parameters once and return a jitted forward function x -> MLP(x)."""
    wb, dims, pdims, out_dim = prepare_mlp_params(params)
    single_buffer = _single_buffer_supported()
    impl = functools.partial(
        _mlp_forward_impl,
        num_layers=len(params), dims=dims, pdims=pdims, out_dim=out_dim,
        sigmoid_output=sigmoid_output, row_tile=row_tile,
        single_buffer=single_buffer)
    fwd = jax.jit(impl)
    return lambda x: fwd(x, wb)


# ----------------------------- parameter init -----------------------------

def init_mlp_params(key, input_dim, hidden_dim, output_dim, num_layers):
    """torch.nn.Linear default init, but weights stored pre-transposed (in, out)."""
    dims = [input_dim] + [hidden_dim] * (num_layers - 1) + [output_dim]
    keys = jax.random.split(key, num_layers)
    params = []
    for i in range(num_layers):
        k1, k2 = jax.random.split(keys[i])
        bound = 1.0 / math.sqrt(dims[i])   # fan_in
        w = jax.random.uniform(k1, (dims[i], dims[i + 1]), jnp.float32, -bound, bound)
        b = jax.random.uniform(k2, (dims[i + 1],), jnp.float32, -bound, bound)
        params.append(dict(w=w, b=b))
    return params


# ----------------------------- pure-JAX reference -----------------------------

def _ref_mlp(x, params, sigmoid_output=False, compute_dtype=jnp.float32):
    """Reference MLP. compute_dtype=float32 is the exact module math;
    compute_dtype=bfloat16 mirrors the kernel's bf16-matmul / f32-accumulate path."""
    h = x.astype(compute_dtype)
    n = len(params)
    for i, p in enumerate(params):
        h = jnp.dot(h, p["w"].astype(compute_dtype),
                    preferred_element_type=jnp.float32) + p["b"].astype(jnp.float32)
        if i < n - 1:
            h = jnp.maximum(h, 0.0).astype(compute_dtype)
    if sigmoid_output:
        h = jax.nn.sigmoid(h)
    return h


# ----------------------------- main -----------------------------

if __name__ == "__main__":
    B, N = 2, 16                     # leading dims (batch, tokens) -> 32 rows
    input_dim, hidden_dim, output_dim, num_layers = 32, 64, 32, 3

    key = jax.random.PRNGKey(0)
    k_x, k_p = jax.random.split(key)
    x = jax.random.normal(k_x, (B, N, input_dim), jnp.float32)
    params = init_mlp_params(k_p, input_dim, hidden_dim, output_dim, num_layers)

    mlp = make_mlp(params, sigmoid_output=False)       # module default
    mlp_sig = make_mlp(params, sigmoid_output=True)    # sigmoid_output branch

    y = mlp(x)
    y_sig = mlp_sig(x)
    jax.block_until_ready((y, y_sig))

    # Tight check vs a bf16-matched reference, loose check vs exact f32 math.
    y_ref_bf = _ref_mlp(x, params, False, compute_dtype=jnp.bfloat16)
    y_ref_f32 = _ref_mlp(x, params, False, compute_dtype=jnp.float32)
    ys_ref_bf = _ref_mlp(x, params, True, compute_dtype=jnp.bfloat16)
    ys_ref_f32 = _ref_mlp(x, params, True, compute_dtype=jnp.float32)

    assert y.shape == (B, N, output_dim)
    assert np.allclose(np.asarray(y), np.asarray(y_ref_bf), rtol=2e-3, atol=2e-3)
    assert np.allclose(np.asarray(y), np.asarray(y_ref_f32), rtol=5e-2, atol=5e-2)
    assert np.allclose(np.asarray(y_sig), np.asarray(ys_ref_bf), rtol=2e-3, atol=2e-3)
    assert np.allclose(np.asarray(y_sig), np.asarray(ys_ref_f32), rtol=5e-2, atol=5e-2)

    print("KERNEL_OK")
</pallas_src>

<mosaic_0001>
module attributes {stable_mosaic.version = 11 : i64} {
  func.func @copy_kernel(%arg0: i32, %arg1: memref<8x128xf32, #tpu.memory_space<vmem>>, %arg2: memref<8x128xf32, #tpu.memory_space<vmem>>) attributes {dimension_semantics = [#tpu.dimension_semantics<arbitrary>], iteration_bounds = array<i64: 1>, scalar_prefetch = 0 : i64, scratch_operands = 0 : i64, tpu.core_type = #tpu.core_type<tc>, window_params = [{pipeline_mode = #tpu.pipeline_mode<synchronous>, transform_indices = @transform_0, window_bounds = array<i64: 8, 128>}, {pipeline_mode = #tpu.pipeline_mode<synchronous>, transform_indices = @transform_1, window_bounds = array<i64: 8, 128>}]} {
    %c0 = arith.constant 0 : index
    %c0_0 = arith.constant 0 : index
    %0 = vector.load %arg1[%c0, %c0_0] : memref<8x128xf32, #tpu.memory_space<vmem>>, vector<8x128xf32>
    %c0_1 = arith.constant 0 : index
    %c0_2 = arith.constant 0 : index
    %1 = vector.load %arg2[%c0_1, %c0_2] : memref<8x128xf32, #tpu.memory_space<vmem>>, vector<8x128xf32>
    tpu.vector_store %arg2[%c0_1, %c0_2], %0 {strides = array<i32>} : memref<8x128xf32, #tpu.memory_space<vmem>>, vector<8x128xf32>,
    return
  }
  func.func @transform_0(%arg0: i32) -> (i32, i32) {
    %c0_i32 = arith.constant 0 : i32
    %c0_i32_0 = arith.constant 0 : i32
    %c0_i32_1 = arith.constant 0 : i32
    return %c0_i32, %c0_i32_0 : i32, i32
  }
  func.func @transform_1(%arg0: i32) -> (i32, i32) {
    %c0_i32 = arith.constant 0 : i32
    %c0_i32_0 = arith.constant 0 : i32
    %c0_i32_1 = arith.constant 0 : i32
    return %c0_i32, %c0_i32_0 : i32, i32
  }
}

module attributes {stable_mosaic.version = 11 : i64} {
  func.func @_mlp_fused_kernel(%arg0: i32, %arg1: memref<16x128xbf16, #tpu.memory_space<vmem>>, %arg2: memref<128x128xbf16, #tpu.memory_space<vmem>>, %arg3: memref<1x128xf32, #tpu.memory_space<vmem>>, %arg4: memref<128x128xbf16, #tpu.memory_space<vmem>>, %arg5: memref<1x128xf32, #tpu.memory_space<vmem>>, %arg6: memref<128x128xbf16, #tpu.memory_space<vmem>>, %arg7: memref<1x128xf32, #tpu.memory_space<vmem>>, %arg8: memref<16x128xf32, #tpu.memory_space<vmem>>) attributes {dimension_semantics = [#tpu.dimension_semantics<parallel>], iteration_bounds = array<i64: 2>, scalar_prefetch = 0 : i64, scratch_operands = 0 : i64, tpu.core_type = #tpu.core_type<tc>, window_params = [{transform_indices = @transform_0, window_bounds = array<i64: 16, 128>}, {pipeline_mode = #tpu.pipeline_mode<synchronous>, transform_indices = @transform_1, window_bounds = array<i64: 128, 128>}, {pipeline_mode = #tpu.pipeline_mode<synchronous>, transform_indices = @transform_2, window_bounds = array<i64: 1, 128>}, {pipeline_mode = #tpu.pipeline_mode<synchronous>, transform_indices = @transform_3, window_bounds = array<i64: 128, 128>}, {pipeline_mode = #tpu.pipeline_mode<synchronous>, transform_indices = @transform_4, window_bounds = array<i64: 1, 128>}, {pipeline_mode = #tpu.pipeline_mode<synchronous>, transform_indices = @transform_5, window_bounds = array<i64: 128, 128>}, {pipeline_mode = #tpu.pipeline_mode<synchronous>, transform_indices = @transform_6, window_bounds = array<i64: 1, 128>}, {transform_indices = @transform_7, window_bounds = array<i64: 16, 128>}]} {
    %c0 = arith.constant 0 : index
    %c0_0 = arith.constant 0 : index
    %0 = vector.load %arg1[%c0, %c0_0] : memref<16x128xbf16, #tpu.memory_space<vmem>>, vector<16x128xbf16>
    %c0_1 = arith.constant 0 : index
    %c0_2 = arith.constant 0 : index
    %1 = vector.load %arg2[%c0_1, %c0_2] : memref<128x128xbf16, #tpu.memory_space<vmem>>, vector<128x128xbf16>
    %c0_3 = arith.constant 0 : index
    %c0_4 = arith.constant 0 : index
    %2 = vector.load %arg3[%c0_3, %c0_4] : memref<1x128xf32, #tpu.memory_space<vmem>>, vector<1x128xf32>
    %cst = arith.constant dense<0.000000e+00> : vector<16x128xf32>
    %3 = tpu.matmul %0, %1, %cst {dimension_numbers = #tpu.dot_dimension_numbers<[1], [0], [0], [1], [0, 0, 1, 1], [], []>} : vector<16x128xbf16>, vector<128x128xbf16>, vector<16x128xf32> -> vector<16x128xf32>
    %4 = vector.broadcast %2 : vector<1x128xf32> to vector<16x128xf32>
    %5 = arith.addf %3, %4 : vector<16x128xf32>
    %cst_5 = arith.constant 0.000000e+00 : f32
    %6 = vector.broadcast %cst_5 : f32 to vector<16x128xf32>
    %7 = arith.maximumf %5, %6 : vector<16x128xf32>
    %8 = arith.truncf %7 : vector<16x128xf32> to vector<16x128xbf16>
    %c0_6 = arith.constant 0 : index
    %c0_7 = arith.constant 0 : index
    %9 = vector.load %arg4[%c0_6, %c0_7] : memref<128x128xbf16, #tpu.memory_space<vmem>>, vector<128x128xbf16>
    %c0_8 = arith.constant 0 : index
    %c0_9 = arith.constant 0 : index
    %10 = vector.load %arg5[%c0_8, %c0_9] : memref<1x128xf32, #tpu.memory_space<vmem>>, vector<1x128xf32>
    %cst_10 = arith.constant dense<0.000000e+00> : vector<16x128xf32>
    %11 = tpu.matmul %8, %9, %cst_10 {dimension_numbers = #tpu.dot_dimension_numbers<[1], [0], [0], [1], [0, 0, 1, 1], [], []>} : vector<16x128xbf16>, vector<128x128xbf16>, vector<16x128xf32> -> vector<16x128xf32>
    %12 = vector.broadcast %10 : vector<1x128xf32> to vector<16x128xf32>
    %13 = arith.addf %11, %12 : vector<16x128xf32>
    %cst_11 = arith.constant 0.000000e+00 : f32
    %14 = vector.broadcast %cst_11 : f32 to vector<16x128xf32>
    %15 = arith.maximumf %13, %14 : vector<16x128xf32>
    %16 = arith.truncf %15 : vector<16x128xf32> to vector<16x128xbf16>
    %c0_12 = arith.constant 0 : index
    %c0_13 = arith.constant 0 : index
    %17 = vector.load %arg6[%c0_12, %c0_13] : memref<128x128xbf16, #tpu.memory_space<vmem>>, vector<128x128xbf16>
    %c0_14 = arith.constant 0 : index
    %c0_15 = arith.constant 0 : index
    %18 = vector.load %arg7[%c0_14, %c0_15] : memref<1x128xf32, #tpu.memory_space<vmem>>, vector<1x128xf32>
    %cst_16 = arith.constant dense<0.000000e+00> : vector<16x128xf32>
    %19 = tpu.matmul %16, %17, %cst_16 {dimension_numbers = #tpu.dot_dimension_numbers<[1], [0], [0], [1], [0, 0, 1, 1], [], []>} : vector<16x128xbf16>, vector<128x128xbf16>, vector<16x128xf32> -> vector<16x128xf32>
    %20 = vector.broadcast %18 : vector<1x128xf32> to vector<16x128xf32>
    %21 = arith.addf %19, %20 : vector<16x128xf32>
    %c0_17 = arith.constant 0 : index
    %c0_18 = arith.constant 0 : index
    %22 = vector.load %arg8[%c0_17, %c0_18] : memref<16x128xf32, #tpu.memory_space<vmem>>, vector<16x128xf32>
    tpu.vector_store %arg8[%c0_17, %c0_18], %21 {strides = array<i32>} : memref<16x128xf32, #tpu.memory_space<vmem>>, vector<16x128xf32>,
    return
  }
  func.func @transform_0(%arg0: i32) -> (i32, i32) {
    %c0_i32 = arith.constant 0 : i32
    %c0_i32_0 = arith.constant 0 : i32
    return %arg0, %c0_i32 : i32, i32
  }
  func.func @transform_1(%arg0: i32) -> (i32, i32) {
    %c0_i32 = arith.constant 0 : i32
    %c0_i32_0 = arith.constant 0 : i32
    %c0_i32_1 = arith.constant 0 : i32
    return %c0_i32, %c0_i32_0 : i32, i32
  }
  func.func @transform_2(%arg0: i32) -> (i32, i32) {
    %c0_i32 = arith.constant 0 : i32
    %c0_i32_0 = arith.constant 0 : i32
    %c0_i32_1 = arith.constant 0 : i32
    return %c0_i32, %c0_i32_0 : i32, i32
  }
  func.func @transform_3(%arg0: i32) -> (i32, i32) {
    %c0_i32 = arith.constant 0 : i32
    %c0_i32_0 = arith.constant 0 : i32
    %c0_i32_1 = arith.constant 0 : i32
    return %c0_i32, %c0_i32_0 : i32, i32
  }
  func.func @transform_4(%arg0: i32) -> (i32, i32) {
    %c0_i32 = arith.constant 0 : i32
    %c0_i32_0 = arith.constant 0 : i32
    %c0_i32_1 = arith.constant 0 : i32
    return %c0_i32, %c0_i32_0 : i32, i32
  }
  func.func @transform_5(%arg0: i32) -> (i32, i32) {
    %c0_i32 = arith.constant 0 : i32
    %c0_i32_0 = arith.constant 0 : i32
    %c0_i32_1 = arith.constant 0 : i32
    return %c0_i32, %c0_i32_0 : i32, i32
  }
  func.func @transform_6(%arg0: i32) -> (i32, i32) {
    %c0_i32 = arith.constant 0 : i32
    %c0_i32_0 = arith.constant 0 : i32
    %c0_i32_1 = arith.constant 0 : i32
    return %c0_i32, %c0_i32_0 : i32, i32
  }
  func.func @transform_7(%arg0: i32) -> (i32, i32) {
    %c0_i32 = arith.constant 0 : i32
    %c0_i32_0 = arith.constant 0 : i32
    return %arg0, %c0_i32 : i32, i32
  }
}

</mosaic_0001>

<bundles_post_ra>
// kernel: tpu_custom_call.1
= control target key start
LH: loop header
LB: loop body
LE: loop exit
PB: predicated region body
PF: predicated region fallthrough
CT: control target
= control target key end

     0   :  { %6 = vsyncpa [#allocation3], 0  ;;  %s114_s0 = inlined_call_operand.hbm [shape: f32[8,128], index: 0, kind: input, shape index: {}]   ;;  %s115_s1 = inlined_call_operand.hbm [shape: f32[8,128], index: 1, kind: output, shape index: {}]  }
   0x1   :  { %7 = vsyncpa [#allocation4], 0  ;;  %s13_s8 = sshll.u32 %s114_s0, 4  ;;  %s96_s9 = smov [#allocation2]   ;;  %s14_s8 = int_to_ptr.hbm [resolvable:$true] %s13_s8 }
   0x2   :  { %s15_s10 = sshll.u32 %s96_s9, 4  ;;  %s16_s10 = int_to_ptr.vmem [resolvable:$true] %s15_s10 }
   0x3   :  { %18 = dma.hbm_to_vmem [thread:$0]  %s14_s8, 128, %s16_s10, [#allocation3]  }
   0x4   :  { %92 = dma.done.wait [#allocation3], 128  }
   0x5   :  { %93 = vsyncadd [#allocation3], 4294967168  ;;  %s97_s11 = smov [#allocation5]   ;;  %s32_s15 = sshll.u32 %s115_s1, 4  ;;  %v23_v0 = vld [vmem:[#allocation2] sm:$0xff]  ;;  %s33_s15 = int_to_ptr.hbm [resolvable:$true] %s32_s15 }
   0x6   :  { %s30_s12 = sshll.u32 %s97_s11, 4  ;;  %24 = vst [vmem:[#allocation5] sm:$0xff] %v23_v0  ;;  %s31_s12 = int_to_ptr.vmem [resolvable:$true] %s30_s12 }
   0x7   :  { %35 = dma.vmem_to_hbm [thread:$0]  %s31_s12, 128, %s33_s15, [#allocation4]  }
   0x8   :  { %94 = dma.done.wait [#allocation4], 128  }
   0x9   :  { %95 = vsyncadd [#allocation4], 4294967168 }
   0xa   :  { %40 = vsyncpa [#allocation3], 1 }
   0xb   :  { %41 = vsyncpa [#allocation4], 1 }

// kernel: _mlp_forward_impl.1
= control target key start
LH: loop header
LB: loop body
LE: loop exit
PB: predicated region body
PF: predicated region fallthrough
CT: control target
= control target key end

     0   :  { %12 = vsyncpa [#allocation3], 0  ;;  %s1205_s0 = inlined_call_operand.vmem [shape: bf16[32,128], index: 0, kind: input, shape index: {}]   ;;  %s1206_s1 = inlined_call_operand.vmem [shape: bf16[128,128], index: 1, kind: input, shape index: {}]   ;;  %s1207_s2 = inlined_call_operand.vmem [shape: f32[1,128], index: 2, kind: input, shape index: {}]   ;;  %s1208_s3 = inlined_call_operand.hbm [shape: bf16[128,128], index: 3, kind: input, shape index: {}]   ;;  %s1209_s4 = inlined_call_operand.vmem [shape: f32[1,128], index: 4, kind: input, shape index: {}]   ;;  %s1210_s5 = inlined_call_operand.hbm [shape: bf16[128,128], index: 5, kind: input, shape index: {}]   ;;  %s1211_s6 = inlined_call_operand.vmem [shape: f32[1,128], index: 6, kind: input, shape index: {}]   ;;  %s1212_s7 = inlined_call_operand.hbm [shape: f32[32,128], index: 7, kind: output, shape index: {}]  }
   0x1   :  { %13 = vsyncpa [#allocation6], 0 }
   0x2   :  { %14 = vsyncpa [#allocation4], 0 }
   0x3   :  { %16 = vsyncpa [#allocation4 + $0x1], 0  ;;  %s1063_s24 = smov 0   ;;  %s1065_s25 = smov 0  }
   0x4   :  { %s1067_s26 = smov 0   ;;  %s1069_s27 = smov 0  }
   0x5 LB: > { %s1084_s28 = sadd.s32 4294967295, %s1015_s27   ;;  %s676_s29 = sadd.s32 4294967294, %s1015_s27   ;;  %s1015_s27 = sphi %s1069_s27, %s1219_s27   ;;  %s1011_s26 = sphi %s1067_s26, %s1218_s26   ;;  %s1007_s25 = sphi %s1065_s25, %s1217_s25   ;;  %s1003_s24 = sphi %s1063_s24, %s1216_s24  }
   0x6   : > { %s1088_s30 = sadd.s32 1, %s1015_s27   ;;  %s181_s8 = sadd.s32 1, %s1011_s26 }
   0x7   : > { %s178_s9 = ssub.s32 %s1015_s27, %s1088_s30  ;;  %p191_p0 = scmp.ne.s32.totalorder %s1011_s26, %s1007_s25 }
   0x8   : > { %p179_p1 = scmp.eq.s32.totalorder %s178_s9, 0  ;;  %p192_p2 = scmp.eq.s32.totalorder %s1084_s28, 1 }
   0x9   : > { %p197_p3 = scmp.ne.s32.totalorder %s1007_s25, %s1003_s24  ;;  %p198_p4 = scmp.eq.s32.totalorder %s676_s29, 1 }
   0xa   : > { %s1099_s10 = scalar_select %p179_p1, %s1011_s26, %s181_s8  }
   0xb   : > { %p1101_p5 = por %p192_p2, %p191_p0  ;;  %p1105_p6 = por %p198_p4, %p197_p3 }
   0xc   : > { %p677_p7 = scmp.ge.s32.totalorder %s1015_s27, 1  ;;  %p205_p8 = scmp.lt.s32.totalorder %s1015_s27, 3 }
   0xd   : > { %p839_p9 = scmp.eq.s32.totalorder %s1084_s28, 0  ;;  %s222_s16 = sshll.u32 %s1208_s3, 4  ;;  %s223_s16 = int_to_ptr.hbm [resolvable:$true] %s222_s16 }
   0xe   : > { %p1112_p10 = pnand %p677_p7, %p205_p8  ;;  %s1017_s17 = smov [#allocation2]  }
   0xf   : > { %s224_s18 = sshll.u32 %s1017_s17, 4  ;;  %s239_s21 = sshll.u32 %s1210_s5, 4  ;;  %s225_s18 = int_to_ptr.vmem [resolvable:$true] %s224_s18  ;;  %s240_s21 = int_to_ptr.hbm [resolvable:$true] %s239_s21 }
  0x10   : > { %p828_p11 = pneg %p1112_p10  ;;  %s1018_s22 = smov 64  }
  0x11   : > { %s1019_s23 = smov 4   ;;  %s1020_s29 = smov [#allocation5]  }
  0x12   : > { %p829_p12 = pnand %p839_p9, %p828_p11  ;;  %s241_s8 = sshll.u32 %s1020_s29, 4  ;;  %s242_s8 = int_to_ptr.vmem [resolvable:$true] %s241_s8 }
  0x13   : > { %269 = sbr.rel (%p1112_p10) target bundleno = 485 (0x1e5), region = 48 }
  0x14   : > { %831 = dma.hbm_to_vmem [thread:$0]  (!%p829_p12), %s223_s16, 1024, %s225_s18, [#allocation3], %s1018_s22, %s1018_s22, %s1019_s23  }
  0x15   : > { %834 = dma.hbm_to_vmem [thread:$0]  (!%p829_p12), %s240_s21, 1024, %s242_s8, [#allocation6], %s1018_s22, %s1018_s22, %s1019_s23  }
  0x18   : > { %990 = dma.done.wait (%p839_p9), [#allocation3], 1024  }
  0x19   : > { %992 = vsyncadd (%p839_p9), [#allocation3], 4294966272 }
  0x1a   : > { %994 = dma.done.wait (%p839_p9), [#allocation6], 1024  }
  0x1b   : > { %996 = vsyncadd (%p839_p9), [#allocation6], 4294966272  ;;  %v800_v0 = vld [vmem:[%s1206_s1 + $0x38] sm:$0xff]  ;;  %v799_v1 = vld [vmem:[%s1206_s1 + $0x30] sm:$0xff]  ;;  %s685_s20 = sshll.u32 %s1084_s28, 1  ;;  %s304_s23 = sand.u32 1, %s1007_s25  }
  0x1c   : > { %390 = vmatpush.bf16.msra.mxu0 %v800_v0  ;;  %v808_v2 = vld [vmem:[#allocation2 + $0x38] sm:$0xff]  ;;  %v807_v3 = vld [vmem:[#allocation2 + $0x30] sm:$0xff]  ;;  %v798_v4 = vld [vmem:[%s1206_s1 + $0x28] sm:$0xff]  ;;  %p308_p13 = scmp.lt.s32.totalorder %s685_s20, 3  ;;  %s684_s29 = sshll.u32 %s304_s23, 4 }
  0x1d   : > { %475 = vmatpush.bf16.msra.mxu1 %v808_v2  ;;  %v806_v5 = vld [vmem:[#allocation2 + $0x28] sm:$0xff]  ;;  %v797_v6 = vld [vmem:[%s1206_s1 + $0x20] sm:$0xff]  ;;  %v796_v8 = vld [vmem:[%s1206_s1 + $0x18] sm:$0xff]  ;;  %s306_s17 = scalar_lea.vmem [#allocation7], %s684_s29  ;;  %s965_s29 = scalar_lea.hbm %s1212_s7, 32 }
  0x1e   : > { %v805_v7 = vld [vmem:[#allocation2 + $0x20] sm:$0xff]  ;;  %v795_v9 = vld [vmem:[%s1206_s1 + $0x10] sm:$0xff]  ;;  %s1221_s20 = smov (!%p308_p13, %s685_s20), 3  ;;  %v794_v10 = vld [vmem:[%s1206_s1 + $0x8] sm:$0xff] }
  0x1f   : > { %s686_s14 = sshll.u32 %s1221_s20, 2  ;;  %v793_v11 = vld [vmem:[%s1206_s1] sm:$0xff]  ;;  %v804_v13 = vld [vmem:[#allocation2 + $0x18] sm:$0xff]  ;;  %v803_v14 = vld [vmem:[#allocation2 + $0x10] sm:$0xff]  ;;  %s577_s20 = scalar_lea.sflag [#allocation4], %s304_s23 }
  0x20   : > { %391 = vmatpush.bf16.msra.mxu0 %v799_v1  ;;  %s311_s18 = scalar_lea.vmem %s1205_s0, %s686_s14  ;;  %v802_v15 = vld [vmem:[#allocation2 + $0x8] sm:$0xff]  ;;  %v801_v16 = vld [vmem:[#allocation2] sm:$0xff]  ;;  %v816_v17 = vld [vmem:[#allocation5 + $0x38] sm:$0xff]  ;;  %s817_s14 = sshll.u32 %s1084_s28, 4 }
  0x21   : > { %476 = vmatpush.bf16.msra.mxu1 %v807_v3  ;;  %v792_v12 = vld [vmem:[%s311_s18] sm:$0xff]  ;;  %560 = vmatpush.bf16.msra.mxu2 %v816_v17  ;;  %v815_v18 = vld [vmem:[#allocation5 + $0x30] sm:$0xff]  ;;  %v814_v19 = vld [vmem:[#allocation5 + $0x28] sm:$0xff]  ;;  %s588_s16 = scalar_lea.hbm %s1212_s7, %s817_s14  ;;  %s589_s18 = sshll.u32 %s306_s17, 4  ;;  %s590_s18 = int_to_ptr.vmem [resolvable:$true] %s589_s18 }
  0x22   : > { %v813_v20 = vld [vmem:[#allocation5 + $0x20] sm:$0xff]  ;;  %v812_v29 = vld [vmem:[#allocation5 + $0x18] sm:$0xff]  ;;  %v811_v30 = vld [vmem:[#allocation5 + $0x10] sm:$0xff]  ;;  %s591_s19 = sshll.u32 %s588_s16, 4  ;;  %s592_s19 = int_to_ptr.hbm [resolvable:$true] %s591_s19 }
  0x23   : > { %v882_v22 = vld [vmem:[%s1207_s2] ss:$0 sm:$0xff]  ;;  %v810_v31 = vld [vmem:[#allocation5 + $0x8] sm:$0xff]  ;;  %s959_s21 = sshra.s32 %s592_s19, 4  ;;  %s960_s21 = int_to_ptr.hbm [resolvable:$true] %s959_s21 }
  0x24   : > { %392 = vmatpush.bf16.msra.mxu0 %v798_v4  ;;  %v809_v32 = vld [vmem:[#allocation5] sm:$0xff]  ;;  %s961_s28 = scalar_lea.hbm %s960_s21, 16  ;;  %p966_p3 = scmp.lt.s32.totalorder %s960_s21, %s1212_s7 }
  0x25   : > { %477 = vmatpush.bf16.msra.mxu1 %v806_v5  ;;  %561 = vmatpush.bf16.msra.mxu2 %v815_v18  ;;  %v883_v34 = vld [vmem:[%s1209_s4] ss:$0 sm:$0xff]  ;;  %p962_p0 = scmp.ne.s32.totalorder %s960_s21, %s961_s28  ;;  %p967_p4 = scmp.lt.s32.totalorder %s965_s29, %s961_s28 }
  0x26   : > { %v884_v41 = vld [vmem:[%s1211_s6] ss:$0 sm:$0xff] }
  0x27   : > { %p963_p1 = pnand %p962_p0, %p1101_p5  ;;  %p968_p7 = por %p967_p4, %p966_p3 }
  0x28   : > { %393 = vmatpush.bf16.msra.mxu0 %v797_v6 }
  0x29   : > { %478 = vmatpush.bf16.msra.mxu1 %v805_v7  ;;  %562 = vmatpush.bf16.msra.mxu2 %v814_v19  ;;  %p964_p2 = pneg %p963_p1 }
  0x2b   : > { %p969_p8 = pnand %p968_p7, %p964_p2 }
  0x2c   : > { %394 = vmatpush.bf16.msra.mxu0 %v796_v8 }
  0x2d   : > { %479 = vmatpush.bf16.msra.mxu1 %v804_v13  ;;  %563 = vmatpush.bf16.msra.mxu2 %v813_v20 }
  0x30   : > { %395 = vmatpush.bf16.msra.mxu0 %v795_v9 }
  0x31   : > { %480 = vmatpush.bf16.msra.mxu1 %v803_v14  ;;  %564 = vmatpush.bf16.msra.mxu2 %v812_v29 }
  0x34   : > { %396 = vmatpush.bf16.msra.mxu0 %v794_v10 }
  0x35   : > { %481 = vmatpush.bf16.msra.mxu1 %v802_v15  ;;  %565 = vmatpush.bf16.msra.mxu2 %v811_v30 }
  0x38   : > { %397 = vmatpush.bf16.msra.mxu0 %v793_v11 }
  0x39   : > { %482 = vmatpush.bf16.msra.mxu1 %v801_v16  ;;  %566 = vmatpush.bf16.msra.mxu2 %v810_v31 }
  0x3b   : > { %398 = vmatmul.bf16.vlgmr.msra.gmra.mxu0 %v792_v12 }
  0x3d   : > { %567 = vmatpush.bf16.msra.mxu2 %v809_v32 }
  0xb8   : > { %v399_v21 = vpop.f32.mrf.mxu0 }
  0xb9   : > { %v400_v23 = vadd.f32 %v882_v22, %v399_v21 }
  0xbb   : > { %v404_v26 = vmax.f32 %v400_v23, 0.0 }
  0xc0   : > { %v401_v24 = vpop.f32.mrf.mxu0 }
  0xc1   : > { %v402_v25 = vadd.f32 %v882_v22, %v401_v24 }
  0xc3   : > { %v405_v27 = vmax.f32 %v402_v25, 0.0 }
  0xc5   : > { %v406_v28 = vpack.c.bf16 %v405_v27, %v404_v26 }
  0xc7   : > { %483 = vmatmul.bf16.vlgmr.msra.gmra.mxu1 %v406_v28 }
 0x144   : > { %v484_v33 = vpop.f32.mrf.mxu1 }
 0x145   : > { %v485_v35 = vadd.f32 %v883_v34, %v484_v33 }
 0x147   : > { %v489_v38 = vmax.f32 %v485_v35, 0.0 }
 0x14c   : > { %v486_v36 = vpop.f32.mrf.mxu1 }
 0x14d   : > { %v487_v37 = vadd.f32 %v883_v34, %v486_v36 }
 0x14f   : > { %v490_v39 = vmax.f32 %v487_v37, 0.0 }
 0x151   : > { %v491_v40 = vpack.c.bf16 %v490_v39, %v489_v38 }
 0x153   : > { %568 = vmatmul.bf16.vlgmr.msra.gmra.mxu2 %v491_v40 }
 0x1d6   : > { %v569_v42 = vpop.f32.mrf.mxu2 }
 0x1d7   : > { %v570_v43 = vadd.f32 %v884_v41, %v569_v42 }
 0x1d9   : > { %574 = vst [vmem:[%s306_s17] sm:$0xff] %v570_v43 }
 0x1de   : > { %v571_v44 = vpop.f32.mrf.mxu2 }
 0x1df   : > { %v572_v45 = vadd.f32 %v884_v41, %v571_v44 }
 0x1e1   : > { %575 = vst [vmem:[%s306_s17 + $0x8] sm:$0xff] %v572_v45 }
 0x1e2   : > { %972 = shalt.err (!%p969_p8)
}
 0x1e3   : > { %s1021_s23 = smov 128   ;;  %s1022_s13 = smov 8  }
 0x1e4   : > { %826 = dma.vmem_to_hbm [thread:$0]  (%p1101_p5), %s590_s18, 256, %s592_s19, %s577_s20, %s1021_s23, %s1021_s23, %s1022_s13  }
 0x1e5 PF: > { %p843_p9 = scmp.ge.s32.totalorder %s1015_s27, 2  ;;  %s606_s15 = sand.u32 1, %s1003_s24  }
 0x1e6   : > { %s607_s16 = scalar_lea.sflag [#allocation4], %s606_s15 }
 0x1e7   : > { %p836_p10 = pnand %p843_p9, %p1105_p6 }
 0x1e9   : > { %p837_p11 = pneg %p836_p10 }
 0x1eb   : > { %998 = dma.done.wait (%p837_p11), %s607_s16, 256  }
 0x1ec   : > { %1000 = vsyncadd (%p837_p11), %s607_s16, 4294967040  ;;  %p19_p12 = scmp.ge.s32.totalorder %s1088_s30, 4   ;;  %s1216_s24 = smov %s1007_s25 }
 0x1ed   : > { %s1217_s25 = smov %s1011_s26  ;;  %s1218_s26 = smov %s1099_s10 }
 0x1ee   : > { %s1219_s27 = smov %s1088_s30  ;;  %21 = sbr.rel (!%p19_p12) target bundleno = 5 (0x5), region = 92 }
 0x1f3   :  { %613 = vsyncpa [#allocation3], 1 }
 0x1f4   :  { %615 = vsyncpa [#allocation3 + $0x1], 1 }
 0x1f5   :  { %616 = vsyncpa [#allocation6], 1 }
 0x1f6   :  { %617 = vsyncpa [#allocation4], 1 }
 0x1f7   :  { %619 = vsyncpa [#allocation4 + $0x1], 1 }

</bundles_post_ra>
